<compile_context>
chip_gen: v7x
topology: tpu7x:2x2x1
jax: 0.10.0
libtpu: 0.0.40
codegen_flags: <defaults>
</compile_context>

<pallas_src>
import functools

import jax
import jax.numpy as jnp
from jax import lax
from jax.experimental import pallas as pl
from jax.experimental.pallas import tpu as pltpu


# ----------------------------------------------------------------------------
# Fused kernel: one grid step == TB batch elements (to_qkv -> MHA -> to_out)
# ----------------------------------------------------------------------------
def _fused_attention_kernel(x_ref, wq_ref, wk_ref, wv_ref, wo_ref, o_ref, y_acc,
                            *, heads, mxu_dtype):
    # x block: (TB, N, dim). Cast to the MXU operand dtype exactly once.
    x = x_ref[...].astype(mxu_dtype)
    approx_recip = mxu_dtype != jnp.float32

    # Zero the f32 accumulator for this grid step (scratch persists across steps).
    y_acc[...] = jnp.zeros_like(y_acc)

    def head_body(h, carry):
        # Head weights live on a leading axis -> plain leading-dim loads,
        # no unaligned lane slicing.  Scale is already folded into w_q.
        wq = wq_ref[h].astype(mxu_dtype)       # (dim, D)
        wk = wk_ref[h].astype(mxu_dtype)       # (dim, D)
        wv = wv_ref[h].astype(mxu_dtype)       # (dim, D)
        wo = wo_ref[h].astype(mxu_dtype)       # (D, dim)

        # Projections: contract dim; free dims are (TB, N) -> effectively a
        # (TB*N, dim) @ (dim, D) matmul (tall M on the MXU), f32 accumulation.
        q = lax.dot_general(x, wq, (((2,), (0,)), ((), ())),
                            preferred_element_type=jnp.float32)      # (TB, N, D)
        k = lax.dot_general(x, wk, (((2,), (0,)), ((), ())),
                            preferred_element_type=jnp.float32)      # (TB, N, D)
        v = lax.dot_general(x, wv, (((2,), (0,)), ((), ())),
                            preferred_element_type=jnp.float32)      # (TB, N, D)

        # Scores: batch over TB, contract D (last dims) -> no transpose of k.
        s = lax.dot_general(q.astype(mxu_dtype), k.astype(mxu_dtype),
                            (((2,), (2,)), ((0,), (0,))),
                            preferred_element_type=jnp.float32)      # (TB, N, N)

        # Numerically stable softmax in f32; normalization deferred to (TB,N,D).
        m = jnp.max(s, axis=-1, keepdims=True)
        p = jnp.exp(s - m)
        l = jnp.sum(p, axis=-1, keepdims=True)                        # (TB, N, 1)

        o_h = lax.dot_general(p.astype(mxu_dtype), v.astype(mxu_dtype),
                              (((2,), (1,)), ((0,), (0,))),
                              preferred_element_type=jnp.float32)     # (TB, N, D)
        if approx_recip:
            o_h = o_h * pl.reciprocal(l, approx=True)   # EUP slot (bf16 path)
        else:
            o_h = o_h / l                                # exact divide (f32 path)

        # Accumulate this head's output projection: y += o_h @ w_o[h].
        # No head_outs list, no lane-dim concat, MXU-side accumulation.
        y_acc[...] += lax.dot_general(o_h.astype(mxu_dtype), wo,
                                      (((2,), (0,)), ((), ())),
                                      preferred_element_type=jnp.float32)
        return carry

    lax.fori_loop(0, heads, head_body, 0)

    o_ref[...] = y_acc[...].astype(o_ref.dtype)


def _pick_batch_block(B, N, dim, itemsize, target_bytes=512 * 1024):
    """Largest batch block that (a) divides B, (b) keeps >= 2 grid steps when
    B >= 2 (v7x megacore), and (c) stops growing once the per-step x block
    reaches `target_bytes`."""
    if B <= 1:
        return max(B, 1)
    per_batch = N * dim * itemsize
    divisors = [d for d in range(1, B // 2 + 1) if B % d == 0]
    for d in divisors:
        if d * per_batch >= target_bytes:
            return d
    return divisors[-1]


def attention_forward(x, w_qkv, w_out, *, heads, dim_head,
                      mxu_dtype=jnp.bfloat16, batch_block=None):
    """x: (B, N, dim); w_qkv: (dim, 3*heads*dim_head); w_out: (heads*dim_head, dim).

    Weights are stored as (in_features, out_features), i.e. the transpose of the
    PyTorch nn.Linear weight, so y = x @ W matches PyTorch's x @ W.T.
    """
    B, N, dim = x.shape
    inner = heads * dim_head
    assert w_qkv.shape == (dim, 3 * inner) and w_out.shape == (inner, dim)
    scale = dim_head ** (-0.5)

    # --- wrapper-side weight prep (one-time, exact) -------------------------
    # Split q/k/v and put heads on a leading axis: (heads, dim, dim_head).
    # Fold the softmax scale into the Q weights (removes N*inner in-kernel muls).
    w_q = jnp.transpose(w_qkv[:, 0 * inner:1 * inner].reshape(dim, heads, dim_head),
                        (1, 0, 2)) * scale
    w_k = jnp.transpose(w_qkv[:, 1 * inner:2 * inner].reshape(dim, heads, dim_head),
                        (1, 0, 2))
    w_v = jnp.transpose(w_qkv[:, 2 * inner:3 * inner].reshape(dim, heads, dim_head),
                        (1, 0, 2))
    w_o = w_out.reshape(heads, dim_head, dim)               # (heads, D, dim)

    # --- tiling --------------------------------------------------------------
    itemsize = x.dtype.itemsize
    TB = batch_block if batch_block is not None else _pick_batch_block(B, N, dim, itemsize)
    assert B % TB == 0, f"batch_block {TB} must divide B={B}"
    grid = (B // TB,)

    # --- VMEM budget (explicit; >= 32 MiB for v5e, <= 64 MiB for v7x) --------
    x_blk = TB * N * dim * itemsize
    y_blk = TB * N * dim * itemsize
    w_bytes = (3 * heads * dim * dim_head + heads * dim_head * dim) * w_qkv.dtype.itemsize
    scratch_bytes = TB * N * dim * 4
    needed = 2 * (x_blk + y_blk) + 2 * w_bytes + scratch_bytes
    vmem_limit = int(min(max(4 * needed, 32 * 1024 * 1024), 64 * 1024 * 1024))

    kernel = functools.partial(_fused_attention_kernel, heads=heads, mxu_dtype=mxu_dtype)
    return pl.pallas_call(
        kernel,
        out_shape=jax.ShapeDtypeStruct((B, N, dim), x.dtype),
        grid=grid,
        in_specs=[
            pl.BlockSpec((TB, N, dim), lambda b: (b, 0, 0)),
            # Weights: same block every step -> DMA'd once, resident in VMEM.
            pl.BlockSpec((heads, dim, dim_head), lambda b: (0, 0, 0)),
            pl.BlockSpec((heads, dim, dim_head), lambda b: (0, 0, 0)),
            pl.BlockSpec((heads, dim, dim_head), lambda b: (0, 0, 0)),
            pl.BlockSpec((heads, dim_head, dim), lambda b: (0, 0, 0)),
        ],
        out_specs=pl.BlockSpec((TB, N, dim), lambda b: (b, 0, 0)),
        scratch_shapes=[pltpu.VMEM((TB, N, dim), jnp.float32)],
        compiler_params=pltpu.CompilerParams(
            dimension_semantics=("parallel",),   # shard batch across TCs on v7x megacore
            vmem_limit_bytes=vmem_limit,
        ),
    )(x, w_q, w_k, w_v, w_o)


# ----------------------------------------------------------------------------
# Pure-JAX reference (for correctness check)
# ----------------------------------------------------------------------------
def attention_reference(x, w_qkv, w_out, *, heads, dim_head):
    B, N, dim = x.shape
    inner = heads * dim_head
    scale = dim_head ** (-0.5)
    qkv = (x.reshape(B * N, dim) @ w_qkv).reshape(B, N, 3, heads, dim_head)
    q, k, v = (jnp.transpose(qkv[:, :, i], (0, 2, 1, 3)) for i in range(3))
    s = jnp.einsum("bhnd,bhmd->bhnm", q, k) * scale
    p = jax.nn.softmax(s, axis=-1)
    o = jnp.einsum("bhnm,bhmd->bhnd", p, v)
    o = jnp.transpose(o, (0, 2, 1, 3)).reshape(B * N, inner)
    return (o @ w_out).reshape(B, N, dim)


if __name__ == "__main__":
    # Small shapes consistent with the module's forward: x is (B, N, dim)
    B, N, dim = 2, 8, 32
    heads, dim_head = 4, 16
    inner = heads * dim_head

    key = jax.random.PRNGKey(0)
    kx, kq, ko = jax.random.split(key, 3)
    x = jax.random.normal(kx, (B, N, dim), dtype=jnp.float32)
    # Deterministic synthetic weights, stored as (in_features, out_features)
    # (PyTorch nn.Linear does x @ W.T; we store W.T directly -> same math).
    w_qkv = jax.random.normal(kq, (dim, 3 * inner), dtype=jnp.float32) * 0.05
    w_out = jax.random.normal(ko, (inner, dim), dtype=jnp.float32) * 0.05

    y_ref = attention_reference(x, w_qkv, w_out, heads=heads, dim_head=dim_head)

    # Production path: bf16 MXU operands, f32 accumulation & f32 softmax.
    y = attention_forward(x, w_qkv, w_out, heads=heads, dim_head=dim_head,
                          mxu_dtype=jnp.bfloat16)
    y = jax.block_until_ready(y)
    assert jnp.allclose(y, y_ref, atol=5e-3, rtol=2e-2), "bf16 path mismatch vs reference"

    # Debug path: f32 MXU operands, exact divide for the softmax normalization.
    y32 = attention_forward(x, w_qkv, w_out, heads=heads, dim_head=dim_head,
                            mxu_dtype=jnp.float32)
    y32 = jax.block_until_ready(y32)
    assert jnp.allclose(y32, y_ref, atol=2e-3, rtol=2e-2), "f32 path mismatch vs reference"

    print("KERNEL_OK")
</pallas_src>

<mosaic_0001>
module attributes {stable_mosaic.version = 11 : i64} {
  func.func @_fused_attention_kernel(%arg0: i32, %arg1: memref<1x8x32xf32, #tpu.memory_space<vmem>>, %arg2: memref<4x32x16xf32, #tpu.memory_space<vmem>>, %arg3: memref<4x32x16xf32, #tpu.memory_space<vmem>>, %arg4: memref<4x32x16xf32, #tpu.memory_space<vmem>>, %arg5: memref<4x16x32xf32, #tpu.memory_space<vmem>>, %arg6: memref<1x8x32xf32, #tpu.memory_space<vmem>>, %arg7: memref<1x8x32xf32, #tpu.memory_space<vmem>>) attributes {dimension_semantics = [#tpu.dimension_semantics<parallel>], iteration_bounds = array<i64: 2>, scalar_prefetch = 0 : i64, scratch_operands = 1 : i64, tpu.core_type = #tpu.core_type<tc>, window_params = [{transform_indices = @transform_0, window_bounds = array<i64: 1, 8, 32>}, {pipeline_mode = #tpu.pipeline_mode<synchronous>, transform_indices = @transform_1, window_bounds = array<i64: 4, 32, 16>}, {pipeline_mode = #tpu.pipeline_mode<synchronous>, transform_indices = @transform_2, window_bounds = array<i64: 4, 32, 16>}, {pipeline_mode = #tpu.pipeline_mode<synchronous>, transform_indices = @transform_3, window_bounds = array<i64: 4, 32, 16>}, {pipeline_mode = #tpu.pipeline_mode<synchronous>, transform_indices = @transform_4, window_bounds = array<i64: 4, 16, 32>}, {transform_indices = @transform_5, window_bounds = array<i64: 1, 8, 32>}]} {
    %c0 = arith.constant 0 : index
    %c0_0 = arith.constant 0 : index
    %c0_1 = arith.constant 0 : index
    %0 = vector.load %arg1[%c0, %c0_0, %c0_1] : memref<1x8x32xf32, #tpu.memory_space<vmem>>, vector<1x8x32xf32>
    %1 = arith.truncf %0 : vector<1x8x32xf32> to vector<1x8x32xbf16>
    %cst = arith.constant 0.000000e+00 : f32
    %2 = vector.broadcast %cst : f32 to vector<1x8x32xf32>
    %c0_2 = arith.constant 0 : index
    %c0_3 = arith.constant 0 : index
    %c0_4 = arith.constant 0 : index
    %3 = vector.load %arg7[%c0_2, %c0_3, %c0_4] : memref<1x8x32xf32, #tpu.memory_space<vmem>>, vector<1x8x32xf32>
    tpu.vector_store %arg7[%c0_2, %c0_3, %c0_4], %2 {strides = array<i32>} : memref<1x8x32xf32, #tpu.memory_space<vmem>>, vector<1x8x32xf32>,
    %c0_i32 = arith.constant 0 : i32
    %c4_i32 = arith.constant 4 : i32
    %4 = arith.addi %c0_i32, %c4_i32 : i32
    %c1_i32 = arith.constant 1 : i32
    scf.for %arg8 = %c0_i32 to %4 step %c1_i32  : i32 {
      %7 = arith.index_cast %arg8 : i32 to index
      %c0_12 = arith.constant 0 : index
      %c0_13 = arith.constant 0 : index
      %8 = vector.load %arg2[%7, %c0_12, %c0_13] : memref<4x32x16xf32, #tpu.memory_space<vmem>>, vector<1x32x16xf32>
      %9 = vector.shape_cast %8 : vector<1x32x16xf32> to vector<32x16xf32>
      %10 = arith.truncf %9 : vector<32x16xf32> to vector<32x16xbf16>
      %11 = arith.index_cast %arg8 : i32 to index
      %c0_14 = arith.constant 0 : index
      %c0_15 = arith.constant 0 : index
      %12 = vector.load %arg3[%11, %c0_14, %c0_15] : memref<4x32x16xf32, #tpu.memory_space<vmem>>, vector<1x32x16xf32>
      %13 = vector.shape_cast %12 : vector<1x32x16xf32> to vector<32x16xf32>
      %14 = arith.truncf %13 : vector<32x16xf32> to vector<32x16xbf16>
      %15 = arith.index_cast %arg8 : i32 to index
      %c0_16 = arith.constant 0 : index
      %c0_17 = arith.constant 0 : index
      %16 = vector.load %arg4[%15, %c0_16, %c0_17] : memref<4x32x16xf32, #tpu.memory_space<vmem>>, vector<1x32x16xf32>
      %17 = vector.shape_cast %16 : vector<1x32x16xf32> to vector<32x16xf32>
      %18 = arith.truncf %17 : vector<32x16xf32> to vector<32x16xbf16>
      %19 = arith.index_cast %arg8 : i32 to index
      %c0_18 = arith.constant 0 : index
      %c0_19 = arith.constant 0 : index
      %20 = vector.load %arg5[%19, %c0_18, %c0_19] : memref<4x16x32xf32, #tpu.memory_space<vmem>>, vector<1x16x32xf32>
      %21 = vector.shape_cast %20 : vector<1x16x32xf32> to vector<16x32xf32>
      %22 = arith.truncf %21 : vector<16x32xf32> to vector<16x32xbf16>
      %cst_20 = arith.constant dense<0.000000e+00> : vector<1x8x16xf32>
      %23 = tpu.matmul %1, %10, %cst_20 {dimension_numbers = #tpu.dot_dimension_numbers<[2], [0], [0, 1], [1], [0, 0, 0, 1, 1, 1], [], []>} : vector<1x8x32xbf16>, vector<32x16xbf16>, vector<1x8x16xf32> -> vector<1x8x16xf32>
      %cst_21 = arith.constant dense<0.000000e+00> : vector<1x8x16xf32>
      %24 = tpu.matmul %1, %14, %cst_21 {dimension_numbers = #tpu.dot_dimension_numbers<[2], [0], [0, 1], [1], [0, 0, 0, 1, 1, 1], [], []>} : vector<1x8x32xbf16>, vector<32x16xbf16>, vector<1x8x16xf32> -> vector<1x8x16xf32>
      %cst_22 = arith.constant dense<0.000000e+00> : vector<1x8x16xf32>
      %25 = tpu.matmul %1, %18, %cst_22 {dimension_numbers = #tpu.dot_dimension_numbers<[2], [0], [0, 1], [1], [0, 0, 0, 1, 1, 1], [], []>} : vector<1x8x32xbf16>, vector<32x16xbf16>, vector<1x8x16xf32> -> vector<1x8x16xf32>
      %26 = arith.truncf %23 : vector<1x8x16xf32> to vector<1x8x16xbf16>
      %27 = arith.truncf %24 : vector<1x8x16xf32> to vector<1x8x16xbf16>
      %cst_23 = arith.constant dense<0.000000e+00> : vector<1x8x8xf32>
      %28 = tpu.matmul %26, %27, %cst_23 {dimension_numbers = #tpu.dot_dimension_numbers<[2], [2], [1], [1], [0, 0, 0, 1, 1, 1], [0], [0]>} : vector<1x8x16xbf16>, vector<1x8x16xbf16>, vector<1x8x8xf32> -> vector<1x8x8xf32>
      %cst_24 = arith.constant dense<0xFF800000> : vector<1x8xf32>
      %29 = vector.multi_reduction <maximumf>, %28, %cst_24 [2] : vector<1x8x8xf32> to vector<1x8xf32>
      %30 = vector.shape_cast %29 : vector<1x8xf32> to vector<1x8x1xf32>
      %31 = vector.broadcast %30 : vector<1x8x1xf32> to vector<1x8x8xf32>
      %32 = arith.subf %28, %31 : vector<1x8x8xf32>
      %33 = math.exp %32 : vector<1x8x8xf32>
      %cst_25 = arith.constant dense<0.000000e+00> : vector<1x8xf32>
      %34 = vector.multi_reduction <add>, %33, %cst_25 [2] : vector<1x8x8xf32> to vector<1x8xf32>
      %35 = vector.shape_cast %34 : vector<1x8xf32> to vector<1x8x1xf32>
      %36 = arith.truncf %33 : vector<1x8x8xf32> to vector<1x8x8xbf16>
      %37 = arith.truncf %25 : vector<1x8x16xf32> to vector<1x8x16xbf16>
      %cst_26 = arith.constant dense<0.000000e+00> : vector<1x8x16xf32>
      %38 = tpu.matmul %36, %37, %cst_26 {dimension_numbers = #tpu.dot_dimension_numbers<[2], [1], [1], [2], [0, 0, 0, 1, 1, 2], [0], [0]>} : vector<1x8x8xbf16>, vector<1x8x16xbf16>, vector<1x8x16xf32> -> vector<1x8x16xf32>
      %39 = tpu.reciprocal %35 {approx = true} : vector<1x8x1xf32> -> vector<1x8x1xf32>
      %40 = vector.broadcast %39 : vector<1x8x1xf32> to vector<1x8x16xf32>
      %41 = arith.mulf %38, %40 : vector<1x8x16xf32>
      %c0_27 = arith.constant 0 : index
      %c0_28 = arith.constant 0 : index
      %c0_29 = arith.constant 0 : index
      %42 = vector.load %arg7[%c0_27, %c0_28, %c0_29] : memref<1x8x32xf32, #tpu.memory_space<vmem>>, vector<1x8x32xf32>
      %43 = arith.truncf %41 : vector<1x8x16xf32> to vector<1x8x16xbf16>
      %cst_30 = arith.constant dense<0.000000e+00> : vector<1x8x32xf32>
      %44 = tpu.matmul %43, %22, %cst_30 {dimension_numbers = #tpu.dot_dimension_numbers<[2], [0], [0, 1], [1], [0, 0, 0, 1, 1, 1], [], []>} : vector<1x8x16xbf16>, vector<16x32xbf16>, vector<1x8x32xf32> -> vector<1x8x32xf32>
      %45 = arith.addf %42, %44 : vector<1x8x32xf32>
      %c0_31 = arith.constant 0 : index
      %c0_32 = arith.constant 0 : index
      %c0_33 = arith.constant 0 : index
      %46 = vector.load %arg7[%c0_31, %c0_32, %c0_33] : memref<1x8x32xf32, #tpu.memory_space<vmem>>, vector<1x8x32xf32>
      tpu.vector_store %arg7[%c0_31, %c0_32, %c0_33], %45 {strides = array<i32>} : memref<1x8x32xf32, #tpu.memory_space<vmem>>, vector<1x8x32xf32>,
    }
    %c4_i32_5 = arith.constant 4 : i32
    %c0_6 = arith.constant 0 : index
    %c0_7 = arith.constant 0 : index
    %c0_8 = arith.constant 0 : index
    %5 = vector.load %arg7[%c0_6, %c0_7, %c0_8] : memref<1x8x32xf32, #tpu.memory_space<vmem>>, vector<1x8x32xf32>
    %c0_9 = arith.constant 0 : index
    %c0_10 = arith.constant 0 : index
    %c0_11 = arith.constant 0 : index
    %6 = vector.load %arg6[%c0_9, %c0_10, %c0_11] : memref<1x8x32xf32, #tpu.memory_space<vmem>>, vector<1x8x32xf32>
    tpu.vector_store %arg6[%c0_9, %c0_10, %c0_11], %5 {strides = array<i32>} : memref<1x8x32xf32, #tpu.memory_space<vmem>>, vector<1x8x32xf32>,
    return
  }
  func.func @transform_0(%arg0: i32) -> (i32, i32, i32) {
    %c0_i32 = arith.constant 0 : i32
    %c0_i32_0 = arith.constant 0 : i32
    %c0_i32_1 = arith.constant 0 : i32
    return %arg0, %c0_i32, %c0_i32_0 : i32, i32, i32
  }
  func.func @transform_1(%arg0: i32) -> (i32, i32, i32) {
    %c0_i32 = arith.constant 0 : i32
    %c0_i32_0 = arith.constant 0 : i32
    %c0_i32_1 = arith.constant 0 : i32
    %c0_i32_2 = arith.constant 0 : i32
    return %c0_i32, %c0_i32_0, %c0_i32_1 : i32, i32, i32
  }
  func.func @transform_2(%arg0: i32) -> (i32, i32, i32) {
    %c0_i32 = arith.constant 0 : i32
    %c0_i32_0 = arith.constant 0 : i32
    %c0_i32_1 = arith.constant 0 : i32
    %c0_i32_2 = arith.constant 0 : i32
    return %c0_i32, %c0_i32_0, %c0_i32_1 : i32, i32, i32
  }
  func.func @transform_3(%arg0: i32) -> (i32, i32, i32) {
    %c0_i32 = arith.constant 0 : i32
    %c0_i32_0 = arith.constant 0 : i32
    %c0_i32_1 = arith.constant 0 : i32
    %c0_i32_2 = arith.constant 0 : i32
    return %c0_i32, %c0_i32_0, %c0_i32_1 : i32, i32, i32
  }
  func.func @transform_4(%arg0: i32) -> (i32, i32, i32) {
    %c0_i32 = arith.constant 0 : i32
    %c0_i32_0 = arith.constant 0 : i32
    %c0_i32_1 = arith.constant 0 : i32
    %c0_i32_2 = arith.constant 0 : i32
    return %c0_i32, %c0_i32_0, %c0_i32_1 : i32, i32, i32
  }
  func.func @transform_5(%arg0: i32) -> (i32, i32, i32) {
    %c0_i32 = arith.constant 0 : i32
    %c0_i32_0 = arith.constant 0 : i32
    %c0_i32_1 = arith.constant 0 : i32
    return %arg0, %c0_i32, %c0_i32_0 : i32, i32, i32
  }
}

</mosaic_0001>

<bundles_post_ra>
// kernel: tpu_custom_call.1
= control target key start
LH: loop header
LB: loop body
LE: loop exit
PB: predicated region body
PF: predicated region fallthrough
CT: control target
= control target key end

     0   :  { %10 = vsyncpa [#allocation4], 0  ;;  %s1016_s0 = inlined_call_operand.vmem [shape: f32[2,8,32], index: 0, kind: input, shape index: {}]   ;;  %s1017_s1 = inlined_call_operand.vmem [shape: f32[4,32,16], index: 1, kind: input, shape index: {}]   ;;  %s1018_s2 = inlined_call_operand.vmem [shape: f32[4,32,16], index: 2, kind: input, shape index: {}]   ;;  %s1019_s3 = inlined_call_operand.vmem [shape: f32[4,32,16], index: 3, kind: input, shape index: {}]   ;;  %s1020_s4 = inlined_call_operand.vmem [shape: f32[4,16,32], index: 4, kind: input, shape index: {}]   ;;  %s1021_s5 = inlined_call_operand.hbm [shape: f32[2,8,32], index: 5, kind: output, shape index: {}]  }
   0x1   :  { %12 = vsyncpa [#allocation4 + $0x1], 0  ;;  %s861_s18 = smov 0   ;;  %s863_s19 = smov 0  }
   0x2   :  { %s865_s20 = smov 0   ;;  %s867_s21 = smov 0  }
   0x3 LB: > { %s882_s22 = sadd.s32 4294967295, %s821_s21   ;;  %s626_s23 = sadd.s32 4294967294, %s821_s21   ;;  %s821_s21 = sphi %s867_s21, %s1027_s21   ;;  %s817_s20 = sphi %s865_s20, %s1026_s20   ;;  %s813_s19 = sphi %s863_s19, %s1025_s19   ;;  %s809_s18 = sphi %s861_s18, %s1024_s18  }
   0x4   : > { %s886_s24 = sadd.s32 1, %s821_s21   ;;  %s135_s25 = sadd.s32 1, %s817_s20 }
   0x5   : > { %s132_s26 = ssub.s32 %s821_s21, %s886_s24  ;;  %p145_p0 = scmp.ne.s32.totalorder %s817_s20, %s813_s19 }
   0x6   : > { %p133_p1 = scmp.eq.s32.totalorder %s132_s26, 0  ;;  %p146_p2 = scmp.eq.s32.totalorder %s882_s22, 1 }
   0x7   : > { %p151_p3 = scmp.ne.s32.totalorder %s813_s19, %s809_s18  ;;  %p152_p4 = scmp.eq.s32.totalorder %s626_s23, 1 }
   0x8   : > { %s897_s27 = scalar_select %p133_p1, %s817_s20, %s135_s25  }
   0x9   : > { %p899_p5 = por %p146_p2, %p145_p0  ;;  %p903_p6 = por %p152_p4, %p151_p3 }
   0xa   : > { %p629_p7 = scmp.ge.s32.totalorder %s821_s21, 1  ;;  %p189_p8 = scmp.lt.s32.totalorder %s821_s21, 3 }
   0xc   : > { %p190_p9 = pnand %p629_p7, %p189_p8 }
   0xd   : > { %s213_s30 = sand.u32 (!%p190_p9), 1, %s813_s19   ;;  %p216_p10 = scmp.lt.s32.totalorder (!%p190_p9), %s882_s22, 1  ;;  %vm223_vm0 = vcmask (!%p190_p9), 261120   ;;  %v827_v0 = vmov (!%p190_p9), 0.0  }
   0xe   : > { %193 = sbr.rel (%p190_p9) target bundleno = 1085 (0x43d), region = 40  ;;  %s913_s6 = sshll.u32 (!%p190_p9), %s213_s30, 3  ;;  %224 = vst.msk [vmem:[#allocation2] sm:$0xff] (!%p190_p9), %vm223_vm0, %v827_v0 }
   0xf   : > { %s215_s12 = scalar_lea.vmem (!%p190_p9), [#allocation3], %s913_s6  ;;  %s923_s13 = smov (!%p190_p9), 0  }
  0x15   : > { %s217_s7 = scalar_select %p216_p10, %s882_s22, 1 }
  0x17   : > { %s631_s8 = sshll.u32 %s217_s7, 3 }
  0x18   : > { %s219_s11 = scalar_lea.vmem %s1016_s0, %s631_s8 }
  0x19   : > { %v221_v1 = vld [vmem:[%s219_s11] sm:$0xff] }
  0x1a   : > { %v920_v2 = vpack.c.bf16 %v221_v1, %v221_v1 }
  0x1b LB: >> { %v828_v3 = vmov 0.0   ;;  %s929_s14 = sshll.u32 %s825_s13, 5  ;;  %vm829_vm1 = vmmov 0   ;;  %vm383_vm2 = vcmask 130048   ;;  %vm430_vm3 = vcmask 64512   ;;  %s633_s10 = sshll.u32 %s825_s13, 4  ;;  %s825_s13 = sphi %s923_s13, %s230_s13  }
  0x1c   : >> { %667 = vmatprep.subr.bf16.mxu1 %v828_v3  ;;  %659 = vmatprep.subr.bf16.mxu0 %v828_v3  ;;  %s239_s17 = scalar_lea.vmem %s1018_s2, %s929_s14  ;;  %s232_s26 = scalar_lea.vmem %s1017_s1, %s929_s14  ;;  %vm445_vm4 = vcmask 1043456   ;;  %v491_v61 = vld [vmem:[#allocation2] sm:$0xff] }
  0x1d   : >> { %671 = vmatprep.mubr.msk.bf16.mxu1 %vm829_vm1, %v828_v3  ;;  %663 = vmatprep.mubr.msk.bf16.mxu0 %vm829_vm1, %v828_v3  ;;  %v240_v4 = vld [vmem:[%s239_s17] sm:$0xff]  ;;  %v241_v5 = vld [vmem:[%s239_s17 + $0x8] sm:$0xff]  ;;  %v242_v6 = vld [vmem:[%s239_s17 + $0x10] sm:$0xff]  ;;  %s246_s9 = scalar_lea.vmem %s1019_s3, %s929_s14  ;;  %s254_s15 = scalar_lea.vmem %s1020_s4, %s633_s10 }
  0x1e   : >> { %v244_v7 = vpack.c.bf16 %v241_v5, %v240_v4  ;;  %v243_v8 = vld [vmem:[%s239_s17 + $0x18] sm:$0xff]  ;;  %v233_v9 = vld [vmem:[%s232_s26] sm:$0xff]  ;;  %v234_v10 = vld [vmem:[%s232_s26 + $0x8] sm:$0xff]  ;;  %s230_s13 = sadd.s32 1, %s825_s13  }
  0x1f   : >> { %v237_v11 = vpack.c.bf16 %v234_v10, %v233_v9  ;;  %v235_v12 = vld [vmem:[%s232_s26 + $0x10] sm:$0xff]  ;;  %v236_v13 = vld [vmem:[%s232_s26 + $0x18] sm:$0xff]  ;;  %v245_v14 = vpack.c.bf16 %v243_v8, %v242_v6  ;;  %v247_v16 = vld [vmem:[%s246_s9] sm:$0xff]  ;;  %p227_p11 = scmp.ge.s32.totalorder %s230_s13, 4  }
  0x20   : >> { %668 = vmatpush3.bf16.msra.mxu1 %v244_v7  ;;  %v238_v15 = vpack.c.bf16 %v236_v13, %v235_v12  ;;  %v248_v17 = vld [vmem:[%s246_s9 + $0x8] sm:$0xff]  ;;  %v249_v18 = vld [vmem:[%s246_s9 + $0x10] sm:$0xff]  ;;  %v250_v20 = vld [vmem:[%s246_s9 + $0x18] sm:$0xff]  ;;  %s641_s16 = sshll.u32 (%p227_p11), %s882_s22, 7  ;;  %s554_s26 = sshll.u32 (%p227_p11), %s215_s12, 4  ;;  %s555_s26 = int_to_ptr.vmem [resolvable:$true] %s554_s26 }
  0x21   : >> { %669 = vmatprep.subr.bf16.mxu1 %v828_v3  ;;  %660 = vmatpush3.bf16.msra.mxu0 %v237_v11  ;;  %v251_v19 = vpack.c.bf16 %v248_v17, %v247_v16  ;;  %v252_v21 = vpack.c.bf16 %v250_v20, %v249_v18  ;;  %v255_v50 = vld [vmem:[%s254_s15] sm:$0xff]  ;;  %v256_v51 = vld [vmem:[%s254_s15 + $0x8] sm:$0xff]  ;;  %s976_s25 = scalar_lea.hbm (%p227_p11), %s1021_s5, %s641_s16  ;;  %s541_s13 = scalar_lea.sflag (%p227_p11), [#allocation4], %s213_s30 }
  0x22   : >> { %661 = vmatprep.subr.bf16.mxu0 %v828_v3  ;;  %v257_v52 = vpack.c.bf16 %v256_v51, %v255_v50  ;;  %s755_s7 = scalar_lea.vmem (%p227_p11), %s555_s26, 128  ;;  %s830_s8 = smov (%p227_p11), [#allocation3]  }
  0x23   : > { %p756_p12 = scmp.ne.s32.totalorder (%p227_p11), %s555_s26, %s755_s7  ;;  %s759_s22 = sshll.u32 (%p227_p11), %s830_s8, 4  ;;  %s760_s22 = int_to_ptr.vmem [resolvable:$false] %s759_s22 }
  0x24   : >> { %670 = vmatpush3.bf16.msra.mxu1 %v245_v14  ;;  %s761_s9 = scalar_lea.vmem (%p227_p11), %s760_s22, 256  ;;  %p762_p1 = scmp.lt.s32.totalorder (%p227_p11), %s555_s26, %s760_s22 }
  0x25   : >> { %662 = vmatpush3.bf16.msra.mxu0 %v238_v15  ;;  %683 = vmatprep.subr.bf16.mxu1 %v828_v3  ;;  %p757_p13 = pnand (%p227_p11), %p756_p12, %p899_p5  ;;  %p763_p2 = scmp.lt.s32.totalorder (%p227_p11), %s761_s9, %s755_s7 }
  0x26   : >> { %675 = vmatprep.subr.bf16.mxu0 %v828_v3 }
  0x27   : >> { %672 = vmatmul.mubr.msk.bf16.vlgmr.msra.gmra.mrb[0].mxu1 %vm223_vm0, %v920_v2  ;;  %p758_p0 = pneg (%p227_p11), %p757_p13  ;;  %p764_p3 = por (%p227_p11), %p763_p2, %p762_p1 }
  0x28   : >> { %664 = vmatmul.mubr.msk.bf16.vlgmr.msra.gmra.mrb[0].mxu0 %vm223_vm0, %v920_v2  ;;  %685 = vmatprep.mubr.msk.bf16.mxu1 %vm829_vm1, %v828_v3 }
  0x29   : >> { %679 = vmatprep.mubr.msk.bf16.mxu0 %vm829_vm1, %v828_v3  ;;  %676 = vmatpush3.bf16.msra.mxu0 %v251_v19  ;;  %p765_p4 = pnand (%p227_p11), %p764_p3, %p758_p0 }
  0x2a   : >> { %677 = vmatprep.subr.bf16.mxu0 %v828_v3 }
  0x2d   : >> { %678 = vmatpush3.bf16.msra.mxu0 %v252_v21 }
  0x2e   : >> { %689 = vmatprep.subr.bf16.mxu0 %v828_v3 }
  0x30   : >> { %680 = vmatmul.mubr.msk.bf16.vlgmr.msra.gmra.mrb[4].mxu0 %vm223_vm0, %v920_v2 }
  0x31   : >> { %691 = vmatprep.mubr.msk.bf16.mxu0 %vm829_vm1, %v828_v3 }
  0xfa   : >> { %v335_v22 = vpop.f32.mrb[0].mxu1 }
  0xfb   : >> { %v382_v23 = vpack.c.bf16 %v335_v22, %v335_v22  ;;  %v673_v24 = vpop.f32.mrb[1].mxu1  ;;  %v295_v25 = vpop.f32.mrb[0].mxu0 }
  0xfc   : >> { %v338_v26 = vpop.f32.mrb[2].mxu1  ;;  %v665_v27 = vpop.f32.mrb[1].mxu0  ;;  %v381_v32 = vpack.c.bf16 %v295_v25, %v295_v25 }
  0xfd   : >> { %v388_v28 = vsel %vm383_vm2, %v382_v23, 0  ;;  %v674_v29 = vpop.f32.mrb[3].mxu1  ;;  %v298_v30 = vpop.f32.mrb[2].mxu0 }
  0xfe   : >> { %684 = vmatpush3.bf16.xpose.msra.mxu1 %v388_v28  ;;  %v666_v31 = vpop.f32.mrb[3].mxu0 }
  0xff   : >> { %695 = vmatprep.subr.bf16.mxu1 %v828_v3 }
 0x103   : >> { %v375_v38 = vpop.f32.mrb[4].mxu0 }
 0x104   : >> { %v441_v39 = vpack.c.bf16 %v375_v38, %v375_v38  ;;  %v681_v40 = vpop.f32.mrb[5].mxu0 }
 0x105   : >> { %686 = vmatmul.mubr.msk.bf16.vlgmr.msra.gmra.mrb[4].mxu1 %vm383_vm2, %v381_v32  ;;  %v378_v41 = vpop.f32.mrb[6].mxu0 }
 0x106   : >> { %697 = vmatprep.mubr.msk.bf16.mxu1 %vm829_vm1, %v828_v3  ;;  %v447_v42 = vsel %vm445_vm4, %v441_v39, 0  ;;  %v682_v43 = vpop.f32.mrb[7].mxu0  ;;  %696 = vmatpush3.bf16.msra.mxu1 %v257_v52 }
 0x107   : >> { %690 = vmatpush3.bf16.msra.mxu0 %v447_v42 }
 0x1d8   : >> { %v424_v33 = vpop.f32.mrb[4].mxu1 }
 0x1d9   : >> { %v687_v34 = vpop.f32.mrb[5].mxu1  ;;  %v431_v35 = vsel %vm430_vm3, %v424_v33, -inf }
 0x1da   : >> { %432 = vmax.xlane.f32.xlu0 %v431_v35  ;;  %v427_v36 = vpop.f32.mrb[6].mxu1 }
 0x1db   : >> { %v688_v37 = vpop.f32.mrb[7].mxu1 }
 0x267   : >> { %v433_v44 = vpop.xlane.xlu0 %432 }
 0x268   : >> { %v434_v45 = vsub.f32 %v424_v33, %v433_v44 }
 0x26a   : >> { %v435_v46 = vmul.f32 1.442695, %v434_v45 }
 0x26c   : >> { %751 = vpow2.f32 %v435_v46 }
 0x276   : >> { %v752_v47 = vpop.eup %751 }
 0x277   : >> { %v437_v48 = vsel %vm430_vm3, %v752_v47, 0.0  ;;  %v440_v49 = vpack.c.bf16 %v752_v47, %v752_v47 }
 0x278   : >> { %438 = vadd.xlane.f32.xlu0 %v437_v48 }
 0x279   : >> { %692 = vmatmul.mubr.msk.bf16.vlgmr.msra.gmra.mrb[8].mxu0 %vm430_vm3, %v440_v49 }
 0x305   : >> { %v439_v53 = vpop.xlane.xlu0 %438 }
 0x306   : >> { %753 = vrcp.f32 %v439_v53 }
 0x310   : >> { %v754_v54 = vpop.eup %753 }
 0x34c   : >> { %v483_v55 = vpop.f32.mrb[8].mxu0 }
 0x34d   : >> { %v490_v56 = vmul.f32 %v754_v54, %v483_v55  ;;  %v693_v57 = vpop.f32.mrb[9].mxu0 }
 0x34e   : >> { %v486_v58 = vpop.f32.mrb[10].mxu0 }
 0x34f   : >> { %v492_v59 = vpack.c.bf16 %v490_v56, %v490_v56  ;;  %v694_v60 = vpop.f32.mrb[11].mxu0 }
 0x351   : >> { %698 = vmatmul.mubr.msk.bf16.vlgmr.msra.gmra.mrb[8].mxu1 %vm383_vm2, %v492_v59 }
 0x421   : > { %229 = sbr.rel (!%p227_p11) target bundleno = 27 (0x1b), region = 86 }
 0x424   : >> { %v530_v62 = vpop.f32.mrb[8].mxu1 }
 0x425   : >> { %v536_v63 = vadd.f32 %v530_v62, %v491_v61  ;;  %v699_v0 = vpop.f32.mrb[9].mxu1 }
 0x426   : >> { %v533_v1 = vpop.f32.mrb[10].mxu1 }
 0x427   : >> { %537 = vst.msk [vmem:[#allocation2] sm:$0xff] %vm223_vm0, %v536_v63  ;;  %v700_v3 = vpop.f32.mrb[11].mxu1 }
 0x42e   : > { %v538_v4 = vld [vmem:[#allocation2] sm:$0xff] }
 0x42f   : > { %539 = vst.msk [vmem:[%s215_s12] sm:$0xff] %vm223_vm0, %v538_v4 }
 0x430   : > { %768 = shalt.err (!%p765_p4)
}
 0x431   : > { %s769_s30 = scalar_lea.hbm %s976_s25, 128  ;;  %s773_s10 = scalar_lea.hbm %s1021_s5, 256 }
 0x432   : > { %p770_p7 = scmp.ne.s32.totalorder %s976_s25, %s769_s30  ;;  %p774_p10 = scmp.lt.u32.totalorder %s976_s25, %s1021_s5 }
 0x433   : > { %p775_p11 = scmp.lt.u32.totalorder %s773_s10, %s769_s30  ;;  %p777_p13 = scmp.lt.u32.totalorder %s769_s30, %s976_s25 }
 0x434   : > { %p771_p8 = pnand %p770_p7, %p899_p5 }
 0x435   : > { %p776_p12 = por %p775_p11, %p774_p10 }
 0x436   : > { %p772_p9 = pneg %p771_p8 }
 0x437   : > { %p778_p0 = por %p777_p13, %p776_p12 }
 0x439   : > { %p779_p1 = pnand %p778_p0, %p772_p9 }
 0x43b   : > { %782 = shalt.err (!%p779_p1)
}
 0x43c   : > { %701 = dma.vmem_to_hbm [thread:$0]  (%p899_p5), %s555_s26, 128, %s976_s25, %s541_s13  }
 0x43d PF: > { %p707_p2 = scmp.ge.s32.totalorder %s821_s21, 2  ;;  %s566_s15 = sand.u32 1, %s809_s18  }
 0x43e   : > { %s567_s16 = scalar_lea.sflag [#allocation4], %s566_s15 }
 0x43f   : > { %p704_p3 = pnand %p707_p2, %p903_p6 }
 0x441   : > { %804 = dma.done.wait (!%p704_p3), %s567_s16, 128  }
 0x442   : > { %806 = vsyncadd (!%p704_p3), %s567_s16, 4294967168  ;;  %p15_p4 = scmp.ge.s32.totalorder %s886_s24, 4   ;;  %s1024_s18 = smov %s813_s19 }
 0x443   : > { %s1025_s19 = smov %s817_s20  ;;  %s1026_s20 = smov %s897_s27 }
 0x444   : > { %s1027_s21 = smov %s886_s24  ;;  %17 = sbr.rel (!%p15_p4) target bundleno = 3 (0x3), region = 97 }
 0x44b   :  { %572 = vsyncpa [#allocation4], 1 }
 0x44c   :  { %574 = vsyncpa [#allocation4 + $0x1], 1 }

</bundles_post_ra>
